<compile_context>
chip_gen: v5e
topology: v5e:2x2
jax: 0.10.0
libtpu: 0.0.40
codegen_flags: <defaults>
</compile_context>

<pallas_src>
import functools

import jax
import jax.numpy as jnp
from jax.experimental import pallas as pl
from jax.experimental.pallas import tpu as pltpu


def _round_up(x, m):
    return ((x + m - 1) // m) * m


def _mp_kernel(nbhd_ref, x_ref, out_ref, *scratch,
               tk, n_source, x_resident, with_mean, use_acc, compute_dtype):
    """One (target-tile, source-tile) step of acc += N_tile @ X_tile.

    The output/accumulator block index is constant across the k (source) axis, so it
    stays VMEM-resident: zero-initialized at k == 0, accumulated into, and (for the
    mean / non-f32 paths) finalized + stored exactly once at the last k step.
    """
    si = 0
    if use_acc:
        acc_ref = scratch[si]
        si += 1
    else:
        acc_ref = out_ref
    cnt_ref = scratch[si] if with_mean else None

    k = pl.program_id(1)
    k_last = pl.num_programs(1) - 1

    @pl.when(k == 0)
    def _():
        acc_ref[...] = jnp.zeros_like(acc_ref)
        if with_mean:
            cnt_ref[...] = jnp.zeros_like(cnt_ref)

    n_tile = nbhd_ref[...]                                        # [tm, tk], storage dtype

    # N streams un-padded from HBM: mask the garbage columns of the K-boundary tile
    # (boundary-block padding values are unspecified).  Free VPU work vs the MXU/DMA.
    if n_source % tk != 0:
        col = jax.lax.broadcasted_iota(jnp.int32, n_tile.shape, 1)
        n_tile = jnp.where(k * tk + col < n_source, n_tile, jnp.zeros_like(n_tile))

    if with_mean:
        # Messages landing on each target row from this source tile, counted on the
        # ORIGINAL storage dtype (bf16 compute cast cannot flip zero-ness).
        cnt_ref[...] += jnp.sum((n_tile != 0).astype(jnp.float32), axis=1,
                                keepdims=True)

    if x_resident:
        # x_source lives fully in VMEM (constant block index -> DMA'd once);
        # slice the source rows this k-step needs (x rows are padded to tk multiples).
        x_tile = x_ref[pl.ds(pl.multiple_of(k * tk, tk), tk), :]  # [tk, c_pad]
    else:
        x_tile = x_ref[...]                                       # [tk, c_pad]

    # 🟥 message + scale + 🟧 sum-aggregate fused as a matmul on the MXU (f32 acc).
    acc_ref[...] += jnp.dot(n_tile.astype(compute_dtype), x_tile,
                            preferred_element_type=jnp.float32)

    if use_acc:
        @pl.when(k == k_last)
        def _():
            r = acc_ref[...]
            if with_mean:
                r = r / jnp.maximum(cnt_ref[...], 1.0)
            out_ref[...] = r.astype(out_ref.dtype)


def _vmem_capacity_bytes():
    try:
        info = pltpu.get_tpu_info()
        return int(getattr(info, "vmem_capacity_bytes", 128 * 1024 * 1024))
    except Exception:
        return 128 * 1024 * 1024


def message_passing_forward(
    x_source,
    neighborhood,
    x_target=None,
    *,
    aggr_func="sum",
    tm=256,
    tk=None,
    compute_dtype=None,
    x_vmem_budget_bytes=None,
    interpret=False,
):
    """Pallas implementation of MessagePassing.forward (default message, no attention).

    x_source:     [n_source_cells, in_channels]
    neighborhood: [n_target_cells, n_source_cells] dense view of the torch.sparse
                  neighborhood (zeros = no message).  Streamed at its OWN dtype —
                  pre-cast it to bf16 once (e.g. via MessagePassingPallas) to halve
                  the HBM bytes of the dominant stream.
    compute_dtype: operand dtype fed to the MXU (e.g. jnp.bfloat16 on v6e/v7x);
                   accumulation is always f32. None -> result dtype of the inputs.
    Returns:      [n_target_cells, in_channels], dtype of x_source.
    """
    del x_target  # default message() ignores x_target
    if aggr_func not in ("sum", "add", "mean"):
        raise ValueError(f"Unknown aggr_func {aggr_func!r}")
    with_mean = aggr_func == "mean"

    n_target, n_source = neighborhood.shape
    n_source_x, in_channels = x_source.shape
    assert n_source_x == n_source, "x_source rows must match neighborhood columns"

    out_dtype = x_source.dtype
    if compute_dtype is None:
        compute_dtype = jnp.result_type(neighborhood.dtype, x_source.dtype)
    compute_dtype = jnp.dtype(compute_dtype)

    nbhd_itemsize = jnp.dtype(neighborhood.dtype).itemsize
    x_itemsize = compute_dtype.itemsize
    out_itemsize = jnp.dtype(out_dtype).itemsize
    sub = {1: 32, 2: 16, 4: 8}.get(nbhd_itemsize, 8)   # sublane multiple of the N tile

    vmem_cap = _vmem_capacity_bytes()
    if x_vmem_budget_bytes is None:
        # ~32 MiB on 128-MiB-VMEM chips (v5e/v6e), ~16 MiB on v7x (64 MiB).
        x_vmem_budget_bytes = min(32 * 1024 * 1024, vmem_cap // 4)

    # ---- tile selection -------------------------------------------------------
    tm = min(tm, _round_up(n_target, sub))
    tm = _round_up(tm, sub)
    # Keep >= 2 target tiles when there is enough work so the "parallel" i-axis can
    # shard across two TensorCores; split to 128-multiples, never below 128 rows.
    if n_target >= 256 and pl.cdiv(n_target, tm) < 2:
        tm = _round_up(max(128, pl.cdiv(n_target, 2)), max(sub, 128))

    if tk is None:
        # ~2 MiB of N per grid step (amortizes the ~0.35 us fixed per-step overhead):
        # tk = 2048 for f32, 4096 for bf16 at tm = 256.
        tk = pl.cdiv(2 * 1024 * 1024, tm * nbhd_itemsize)
    tk = max(128, _round_up(tk, 128))
    tk = min(tk, _round_up(n_source, 128))

    grid = (pl.cdiv(n_target, tm), pl.cdiv(n_source, tk))

    c_pad = _round_up(in_channels, 128)            # lane-dense output / full MXU lanes
    n_source_pad = _round_up(n_source, tk)         # so resident pl.ds slices stay in-bounds

    # ---- pad + cast ONLY the small operand (x); N streams as-is from HBM -------
    x = jnp.pad(
        x_source.astype(compute_dtype),
        ((0, n_source_pad - n_source), (0, c_pad - in_channels)),
    )

    x_resident = n_source_pad * c_pad * x_itemsize <= x_vmem_budget_bytes
    use_acc = with_mean or (out_dtype != jnp.float32)

    scratch_shapes = []
    if use_acc:
        scratch_shapes.append(pltpu.VMEM((tm, c_pad), jnp.float32))
    if with_mean:
        scratch_shapes.append(pltpu.VMEM((tm, 1), jnp.float32))

    # ---- VMEM budget (double-buffered N stream + x + resident outputs) ---------
    x_rows = n_source_pad if x_resident else tk
    vmem_need = (
        2 * tm * tk * nbhd_itemsize
        + 2 * x_rows * c_pad * x_itemsize
        + 2 * tm * c_pad * out_itemsize
        + (tm * c_pad * 4 if use_acc else 0)
        + (tm * 128 * 4 if with_mean else 0)
    )
    # Cap at 75% of physical VMEM (48 MiB on v7x) to leave compiler scratch headroom.
    vmem_limit = int(min(max(2 * vmem_need, 32 * 1024 * 1024), int(0.75 * vmem_cap)))

    kernel = functools.partial(
        _mp_kernel, tk=tk, n_source=n_source, x_resident=x_resident,
        with_mean=with_mean, use_acc=use_acc, compute_dtype=compute_dtype,
    )

    n_spec = pl.BlockSpec((tm, tk), lambda i, k: (i, k))
    out_spec = pl.BlockSpec((tm, c_pad), lambda i, k: (i, 0))
    out_shape = jax.ShapeDtypeStruct((n_target, c_pad), out_dtype)

    def build(single_buffer_x):
        if x_resident:
            kwargs = {"pipeline_mode": pl.Buffered(1)} if single_buffer_x else {}
            x_spec = pl.BlockSpec((n_source_pad, c_pad), lambda i, k: (0, 0), **kwargs)
        else:
            x_spec = pl.BlockSpec((tk, c_pad), lambda i, k: (k, 0))
        return pl.pallas_call(
            kernel,
            out_shape=out_shape,
            grid_spec=pltpu.PrefetchScalarGridSpec(
                num_scalar_prefetch=0,
                grid=grid,
                in_specs=[n_spec, x_spec],
                out_specs=out_spec,
                scratch_shapes=scratch_shapes,
            ),
            compiler_params=pltpu.CompilerParams(
                dimension_semantics=("parallel", "arbitrary"),
                vmem_limit_bytes=vmem_limit,
            ),
            interpret=interpret,
        )

    if x_resident:
        try:
            out_pad = build(single_buffer_x=True)(neighborhood, x)
        except Exception:
            # Fallback if this JAX version rejects buffer_count=1 for the resident block.
            out_pad = build(single_buffer_x=False)(neighborhood, x)
    else:
        out_pad = build(single_buffer_x=False)(neighborhood, x)

    return out_pad[:, :in_channels]


class MessagePassingPallas:
    """Thin wrapper mirroring topomodelx MessagePassing (base class: no weights).

    When compute_dtype is set (bf16 recommended on v5e/v6e/v7x), the cast of the big
    neighborhood operand is cached across calls (neighborhoods are static in TNNs),
    so the HBM-halving cast is paid once instead of per forward.  Caching is by
    object identity; it applies in eager mode (the typical TNN layer-loop case).
    """

    def __init__(self, aggr_func="sum", att=False,
                 initialization="xavier_uniform", initialization_gain=1.414,
                 compute_dtype=None):
        if att:
            raise NotImplementedError("att=True not supported in this kernel")
        self.aggr_func = aggr_func
        self.att = att
        self.initialization = initialization
        self.initialization_gain = initialization_gain
        self.compute_dtype = None if compute_dtype is None else jnp.dtype(compute_dtype)
        self._nbhd_cache = None  # (original_array, cast_array)

    def _prepared_neighborhood(self, neighborhood):
        if self.compute_dtype is None or neighborhood.dtype == self.compute_dtype:
            return neighborhood
        if self._nbhd_cache is not None and self._nbhd_cache[0] is neighborhood:
            return self._nbhd_cache[1]
        cast = neighborhood.astype(self.compute_dtype)
        self._nbhd_cache = (neighborhood, cast)
        return cast

    def __call__(self, x_source, neighborhood, x_target=None):
        nbhd = self._prepared_neighborhood(neighborhood)
        return message_passing_forward(
            x_source, nbhd, x_target,
            aggr_func=self.aggr_func, compute_dtype=self.compute_dtype,
        )


if __name__ == "__main__":
    key = jax.random.PRNGKey(0)
    k1, k2, k3 = jax.random.split(key, 3)

    # Small, deliberately non-tile-aligned shapes to exercise the in-kernel boundary
    # masking (200 % tk != 0) and the lane-padding path (48 < 128 channels).
    n_target, n_source, in_channels = 96, 200, 48

    x_source = jax.random.normal(k1, (n_source, in_channels), dtype=jnp.float32)

    # Sparse-ish neighborhood matrix (dense storage, ~15% nonzeros).
    mask = (jax.random.uniform(k2, (n_target, n_source)) < 0.15).astype(jnp.float32)
    vals = jax.random.normal(k3, (n_target, n_source), dtype=jnp.float32)
    neighborhood = mask * vals

    ref = neighborhood @ x_source
    cnt_ref = jnp.maximum(
        jnp.sum(neighborhood != 0, axis=1, keepdims=True).astype(jnp.float32), 1.0
    )

    # 1) Default config: big tiles, resident (single-buffered) x, un-padded N stream.
    layer = MessagePassingPallas(aggr_func="sum", att=False)
    out = jax.block_until_ready(layer(x_source, neighborhood))
    assert out.shape == (n_target, in_channels)
    assert jnp.allclose(out, ref, atol=1e-4, rtol=1e-4)

    # 2) Multi-tile grid + streamed-x path: boundary blocks on both grid axes
    #    (partial output writeback + in-kernel K-column masking).
    out2 = jax.block_until_ready(
        message_passing_forward(
            x_source, neighborhood, aggr_func="sum",
            tm=64, tk=128, x_vmem_budget_bytes=0,
        )
    )
    assert jnp.allclose(out2, ref, atol=1e-4, rtol=1e-4)

    # 3) Mean aggregation: per-target counts + divide fused into the kernel epilogue.
    out_mean = jax.block_until_ready(
        MessagePassingPallas(aggr_func="mean")(x_source, neighborhood)
    )
    assert jnp.allclose(out_mean, ref / cnt_ref, atol=1e-4, rtol=1e-4)

    # 4) bf16 operand path (f32 accumulation): the N cast is cached across calls.
    layer_bf16 = MessagePassingPallas(aggr_func="sum", compute_dtype=jnp.bfloat16)
    out_bf16 = jax.block_until_ready(layer_bf16(x_source, neighborhood))
    out_bf16_again = jax.block_until_ready(layer_bf16(x_source, neighborhood))  # cached N
    ref_bf16 = jnp.dot(
        neighborhood.astype(jnp.bfloat16), x_source.astype(jnp.bfloat16),
        preferred_element_type=jnp.float32,
    )
    assert jnp.allclose(out_bf16, ref_bf16, atol=2e-2, rtol=2e-2)
    assert jnp.allclose(out_bf16, out_bf16_again)

    print("KERNEL_OK")
</pallas_src>

<mosaic_0001>
module attributes {stable_mosaic.version = 11 : i64} {
  func.func @_mp_kernel(%arg0: i32, %arg1: i32, %arg2: memref<96x256xf32, #tpu.memory_space<vmem>>, %arg3: memref<256x128xf32, #tpu.memory_space<vmem>>, %arg4: memref<96x128xf32, #tpu.memory_space<vmem>>) attributes {dimension_semantics = [#tpu.dimension_semantics<parallel>, #tpu.dimension_semantics<arbitrary>], iteration_bounds = array<i64: 1, 1>, scalar_prefetch = 0 : i64, scratch_operands = 0 : i64, tpu.core_type = #tpu.core_type<tc>, window_params = [{transform_indices = @transform_0, window_bounds = array<i64: 96, 256>}, {pipeline_mode = #tpu.pipeline_mode<synchronous>, transform_indices = @transform_1, window_bounds = array<i64: 256, 128>}, {transform_indices = @transform_2, window_bounds = array<i64: 96, 128>}]} {
    %c0_i32 = arith.constant 0 : i32
    %0 = arith.cmpi eq, %arg1, %c0_i32 : i32
    %1 = arith.extui %0 : i1 to i32
    %c0_i32_0 = arith.constant 0 : i32
    %2 = arith.cmpi ne, %1, %c0_i32_0 : i32
    scf.if %2 {
      %cst_9 = arith.constant 0.000000e+00 : f32
      %20 = vector.broadcast %cst_9 : f32 to vector<96x128xf32>
      %c0_10 = arith.constant 0 : index
      %c0_11 = arith.constant 0 : index
      %21 = vector.load %arg4[%c0_10, %c0_11] : memref<96x128xf32, #tpu.memory_space<vmem>>, vector<96x128xf32>
      tpu.vector_store %arg4[%c0_10, %c0_11], %20 {strides = array<i32>} : memref<96x128xf32, #tpu.memory_space<vmem>>, vector<96x128xf32>,
    } else {
    }
    %c0 = arith.constant 0 : index
    %c0_1 = arith.constant 0 : index
    %3 = vector.load %arg2[%c0, %c0_1] : memref<96x256xf32, #tpu.memory_space<vmem>>, vector<96x256xf32>
    %4 = tpu.iota {dimensions = array<i32: 1>} : vector<96x256xi32>
    %c256_i32 = arith.constant 256 : i32
    %5 = arith.muli %arg1, %c256_i32 : i32
    %6 = vector.broadcast %5 : i32 to vector<96x256xi32>
    %7 = arith.addi %6, %4 : vector<96x256xi32>
    %c200_i32 = arith.constant 200 : i32
    %8 = vector.broadcast %c200_i32 : i32 to vector<96x256xi32>
    %9 = arith.cmpi slt, %7, %8 : vector<96x256xi32>
    %cst = arith.constant 0.000000e+00 : f32
    %10 = vector.broadcast %cst : f32 to vector<96x256xf32>
    %11 = arith.select %9, %3, %10 : vector<96x256xi1>, vector<96x256xf32>
    %c256_i32_2 = arith.constant 256 : i32
    %12 = arith.muli %arg1, %c256_i32_2 : i32
    %13 = tpu.assume_multiple %12, 256 : i32
    %14 = arith.index_cast %13 : i32 to index
    %c0_3 = arith.constant 0 : index
    %15 = vector.load %arg3[%14, %c0_3] : memref<256x128xf32, #tpu.memory_space<vmem>>, vector<256x128xf32>
    %c0_4 = arith.constant 0 : index
    %c0_5 = arith.constant 0 : index
    %16 = vector.load %arg4[%c0_4, %c0_5] : memref<96x128xf32, #tpu.memory_space<vmem>>, vector<96x128xf32>
    %cst_6 = arith.constant dense<0.000000e+00> : vector<96x128xf32>
    %17 = tpu.matmul %11, %15, %cst_6 {dimension_numbers = #tpu.dot_dimension_numbers<[1], [0], [0], [1], [0, 0, 1, 1], [], []>} : vector<96x256xf32>, vector<256x128xf32>, vector<96x128xf32> -> vector<96x128xf32>
    %18 = arith.addf %16, %17 : vector<96x128xf32>
    %c0_7 = arith.constant 0 : index
    %c0_8 = arith.constant 0 : index
    %19 = vector.load %arg4[%c0_7, %c0_8] : memref<96x128xf32, #tpu.memory_space<vmem>>, vector<96x128xf32>
    tpu.vector_store %arg4[%c0_7, %c0_8], %18 {strides = array<i32>} : memref<96x128xf32, #tpu.memory_space<vmem>>, vector<96x128xf32>,
    return
  }
  func.func @transform_0(%arg0: i32, %arg1: i32) -> (i32, i32) {
    %c0_i32 = arith.constant 0 : i32
    return %arg0, %arg1 : i32, i32
  }
  func.func @transform_1(%arg0: i32, %arg1: i32) -> (i32, i32) {
    %c0_i32 = arith.constant 0 : i32
    %c0_i32_0 = arith.constant 0 : i32
    %c0_i32_1 = arith.constant 0 : i32
    return %c0_i32, %c0_i32_0 : i32, i32
  }
  func.func @transform_2(%arg0: i32, %arg1: i32) -> (i32, i32) {
    %c0_i32 = arith.constant 0 : i32
    %c0_i32_0 = arith.constant 0 : i32
    return %arg0, %c0_i32 : i32, i32
  }
}

module attributes {stable_mosaic.version = 11 : i64} {
  func.func @_mp_kernel(%arg0: i32, %arg1: i32, %arg2: memref<96x256xf32, #tpu.memory_space<vmem>>, %arg3: memref<256x128xf32, #tpu.memory_space<vmem>>, %arg4: memref<96x128xf32, #tpu.memory_space<vmem>>) attributes {dimension_semantics = [#tpu.dimension_semantics<parallel>, #tpu.dimension_semantics<arbitrary>], iteration_bounds = array<i64: 1, 1>, scalar_prefetch = 0 : i64, scratch_operands = 0 : i64, tpu.core_type = #tpu.core_type<tc>, window_params = [{transform_indices = @transform_0, window_bounds = array<i64: 96, 256>}, {pipeline_mode = #tpu.pipeline_mode<synchronous>, transform_indices = @transform_1, window_bounds = array<i64: 256, 128>}, {transform_indices = @transform_2, window_bounds = array<i64: 96, 128>}]} {
    %c0_i32 = arith.constant 0 : i32
    %0 = arith.cmpi eq, %arg1, %c0_i32 : i32
    %1 = arith.extui %0 : i1 to i32
    %c0_i32_0 = arith.constant 0 : i32
    %2 = arith.cmpi ne, %1, %c0_i32_0 : i32
    scf.if %2 {
      %cst_9 = arith.constant 0.000000e+00 : f32
      %20 = vector.broadcast %cst_9 : f32 to vector<96x128xf32>
      %c0_10 = arith.constant 0 : index
      %c0_11 = arith.constant 0 : index
      %21 = vector.load %arg4[%c0_10, %c0_11] : memref<96x128xf32, #tpu.memory_space<vmem>>, vector<96x128xf32>
      tpu.vector_store %arg4[%c0_10, %c0_11], %20 {strides = array<i32>} : memref<96x128xf32, #tpu.memory_space<vmem>>, vector<96x128xf32>,
    } else {
    }
    %c0 = arith.constant 0 : index
    %c0_1 = arith.constant 0 : index
    %3 = vector.load %arg2[%c0, %c0_1] : memref<96x256xf32, #tpu.memory_space<vmem>>, vector<96x256xf32>
    %4 = tpu.iota {dimensions = array<i32: 1>} : vector<96x256xi32>
    %c256_i32 = arith.constant 256 : i32
    %5 = arith.muli %arg1, %c256_i32 : i32
    %6 = vector.broadcast %5 : i32 to vector<96x256xi32>
    %7 = arith.addi %6, %4 : vector<96x256xi32>
    %c200_i32 = arith.constant 200 : i32
    %8 = vector.broadcast %c200_i32 : i32 to vector<96x256xi32>
    %9 = arith.cmpi slt, %7, %8 : vector<96x256xi32>
    %cst = arith.constant 0.000000e+00 : f32
    %10 = vector.broadcast %cst : f32 to vector<96x256xf32>
    %11 = arith.select %9, %3, %10 : vector<96x256xi1>, vector<96x256xf32>
    %c256_i32_2 = arith.constant 256 : i32
    %12 = arith.muli %arg1, %c256_i32_2 : i32
    %13 = tpu.assume_multiple %12, 256 : i32
    %14 = arith.index_cast %13 : i32 to index
    %c0_3 = arith.constant 0 : index
    %15 = vector.load %arg3[%14, %c0_3] : memref<256x128xf32, #tpu.memory_space<vmem>>, vector<256x128xf32>
    %c0_4 = arith.constant 0 : index
    %c0_5 = arith.constant 0 : index
    %16 = vector.load %arg4[%c0_4, %c0_5] : memref<96x128xf32, #tpu.memory_space<vmem>>, vector<96x128xf32>
    %cst_6 = arith.constant dense<0.000000e+00> : vector<96x128xf32>
    %17 = tpu.matmul %11, %15, %cst_6 {dimension_numbers = #tpu.dot_dimension_numbers<[1], [0], [0], [1], [0, 0, 1, 1], [], []>} : vector<96x256xf32>, vector<256x128xf32>, vector<96x128xf32> -> vector<96x128xf32>
    %18 = arith.addf %16, %17 : vector<96x128xf32>
    %c0_7 = arith.constant 0 : index
    %c0_8 = arith.constant 0 : index
    %19 = vector.load %arg4[%c0_7, %c0_8] : memref<96x128xf32, #tpu.memory_space<vmem>>, vector<96x128xf32>
    tpu.vector_store %arg4[%c0_7, %c0_8], %18 {strides = array<i32>} : memref<96x128xf32, #tpu.memory_space<vmem>>, vector<96x128xf32>,
    return
  }
  func.func @transform_0(%arg0: i32, %arg1: i32) -> (i32, i32) {
    %c0_i32 = arith.constant 0 : i32
    return %arg0, %arg1 : i32, i32
  }
  func.func @transform_1(%arg0: i32, %arg1: i32) -> (i32, i32) {
    %c0_i32 = arith.constant 0 : i32
    %c0_i32_0 = arith.constant 0 : i32
    %c0_i32_1 = arith.constant 0 : i32
    return %c0_i32, %c0_i32_0 : i32, i32
  }
  func.func @transform_2(%arg0: i32, %arg1: i32) -> (i32, i32) {
    %c0_i32 = arith.constant 0 : i32
    %c0_i32_0 = arith.constant 0 : i32
    return %arg0, %c0_i32 : i32, i32
  }
}

</mosaic_0001>

<bundles_post_ra>
// kernel: tpu_custom_call.1
= control target key start
LH: loop header
LB: loop body
LE: loop exit
PB: predicated region body
PF: predicated region fallthrough
CT: control target
= control target key end

     0   :  { %7 = vsyncpa [#allocation3], 0  ;;  %s506_s0 = inlined_call_operand.hbm [shape: f32[96,200], index: 0, kind: input, shape index: {}]   ;;  %s507_s1 = inlined_call_operand.hbm [shape: f32[256,128], index: 1, kind: input, shape index: {}]   ;;  %s508_s2 = inlined_call_operand.hbm [shape: f32[96,128], index: 2, kind: output, shape index: {}]  }
   0x1   :  { %8 = vsyncpa [#allocation6], 0 }
   0x2   :  { %9 = vsyncpa [#allocation4], 0  ;;  %s14_s11 = sshll.u32 %s506_s0, 4  ;;  %s442_s12 = smov [#allocation2]   ;;  %s15_s11 = int_to_ptr.hbm [resolvable:$true] %s14_s11 }
   0x3   :  { %s16_s13 = sshll.u32 %s442_s12, 4  ;;  %s27_s16 = sshll.u32 %s507_s1, 4  ;;  %s17_s13 = int_to_ptr.vmem [resolvable:$true] %s16_s13  ;;  %s28_s16 = int_to_ptr.hbm [resolvable:$true] %s27_s16 }
   0x4   :  { %s443_s17 = smov 256   ;;  %s444_s18 = smov 16  }
   0x5   :  { %22 = dma.hbm_to_vmem [thread:$0]  %s15_s11, 3072, %s17_s13, [#allocation3], %s443_s17, %s443_s17, %s444_s18  }
   0x6   :  { %s445_s19 = smov [#allocation5]   ;;  %s446_s21 = smov 128  }
   0x7   :  { %s29_s20 = sshll.u32 %s445_s19, 4  ;;  %s447_s22 = smov 8   ;;  %s30_s20 = int_to_ptr.vmem [resolvable:$true] %s29_s20 }
   0x8   :  { %35 = dma.hbm_to_vmem [thread:$0]  %s28_s16, 4096, %s30_s20, [#allocation6], %s446_s21, %s446_s21, %s447_s22  }
   0x9   :  { %436 = dma.done.wait [#allocation3], 3072  }
   0xa   :  { %437 = vsyncadd [#allocation3], 4294964224 }
   0xb   :  { %438 = dma.done.wait [#allocation6], 4096  }
   0xc   :  { %439 = vsyncadd [#allocation6], 4294963200  ;;  %v133_v0 = vld [vmem:[#allocation5 + $0x78] sm:$0xff]  ;;  %v132_v2 = vld [vmem:[#allocation5 + $0x70] sm:$0xff]  ;;  %v84_v20 = vlaneseq  ;;  %s448_s0 = smov [#allocation7]   ;;  %s298_s25 = sshll.u32 %s508_s2, 4  ;;  %s299_s25 = int_to_ptr.hbm [resolvable:$true] %s298_s25 }
   0xd   :  { %v149_v1 = vld [vmem:[#allocation5 + $0xf8] sm:$0xff]  ;;  %324 = vmatpush.msra.mxu2 %v133_v0  ;;  %v148_v3 = vld [vmem:[#allocation5 + $0xf0] sm:$0xff]  ;;  %v131_v4 = vld [vmem:[#allocation5 + $0x68] sm:$0xff]  ;;  %162 = vmatpush.msra.mxu0 %v133_v0  ;;  %s296_s1 = sshll.u32 %s448_s0, 4  ;;  %s297_s1 = int_to_ptr.vmem [resolvable:$true] %s296_s1 }
   0xe   :  { %340 = vmatpush.msra.mxu3 %v149_v1  ;;  %v147_v5 = vld [vmem:[#allocation5 + $0xe8] sm:$0xff]  ;;  %215 = vmatpush.msra.mxu1 %v149_v1  ;;  %v130_v6 = vld [vmem:[#allocation5 + $0x60] sm:$0xff]  ;;  %v129_v8 = vld [vmem:[#allocation5 + $0x58] sm:$0xff]  ;;  %v85_v25 = vand.u32 127, %v84_v20 }
   0xf   :  { %325 = vmatpush.msra.mxu2 %v132_v2  ;;  %v146_v7 = vld [vmem:[#allocation5 + $0xe0] sm:$0xff]  ;;  %163 = vmatpush.msra.mxu0 %v132_v2  ;;  %v145_v9 = vld [vmem:[#allocation5 + $0xd8] sm:$0xff]  ;;  %v128_v10 = vld [vmem:[#allocation5 + $0x50] sm:$0xff] }
  0x10   :  { %341 = vmatpush.msra.mxu3 %v148_v3  ;;  %216 = vmatpush.msra.mxu1 %v148_v3  ;;  %v144_v11 = vld [vmem:[#allocation5 + $0xd0] sm:$0xff]  ;;  %v127_v12 = vld [vmem:[#allocation5 + $0x48] sm:$0xff]  ;;  %v126_v14 = vld [vmem:[#allocation5 + $0x40] sm:$0xff]  ;;  %v473_v30 = vadd.s32 128, %v85_v25 }
  0x11   :  { %326 = vmatpush.msra.mxu2 %v131_v4  ;;  %164 = vmatpush.msra.mxu0 %v131_v4  ;;  %v143_v13 = vld [vmem:[#allocation5 + $0xc8] sm:$0xff]  ;;  %v142_v15 = vld [vmem:[#allocation5 + $0xc0] sm:$0xff]  ;;  %v125_v16 = vld [vmem:[#allocation5 + $0x38] sm:$0xff] }
  0x12   :  { %342 = vmatpush.msra.mxu3 %v147_v5  ;;  %217 = vmatpush.msra.mxu1 %v147_v5  ;;  %v141_v17 = vld [vmem:[#allocation5 + $0xb8] sm:$0xff]  ;;  %v124_v18 = vld [vmem:[#allocation5 + $0x30] sm:$0xff]  ;;  %v123_v21 = vld [vmem:[#allocation5 + $0x28] sm:$0xff]  ;;  %vm92_vm0 = vcmp.lt.s32.totalorder %v473_v30, 200 }
  0x13   :  { %327 = vmatpush.msra.mxu2 %v130_v6  ;;  %165 = vmatpush.msra.mxu0 %v130_v6  ;;  %v140_v19 = vld [vmem:[#allocation5 + $0xb0] sm:$0xff]  ;;  %v139_v22 = vld [vmem:[#allocation5 + $0xa8] sm:$0xff]  ;;  %v122_v23 = vld [vmem:[#allocation5 + $0x20] sm:$0xff] }
  0x14   :  { %343 = vmatpush.msra.mxu3 %v146_v7  ;;  %218 = vmatpush.msra.mxu1 %v146_v7  ;;  %v138_v24 = vld [vmem:[#allocation5 + $0xa0] sm:$0xff]  ;;  %v121_v26 = vld [vmem:[#allocation5 + $0x18] sm:$0xff]  ;;  %v120_v28 = vld [vmem:[#allocation5 + $0x10] sm:$0xff] }
  0x15   :  { %328 = vmatpush.msra.mxu2 %v129_v8  ;;  %166 = vmatpush.msra.mxu0 %v129_v8  ;;  %v137_v27 = vld [vmem:[#allocation5 + $0x98] sm:$0xff]  ;;  %v136_v29 = vld [vmem:[#allocation5 + $0x90] sm:$0xff]  ;;  %v119_v31 = vld [vmem:[#allocation5 + $0x8] sm:$0xff] }
  0x16   :  { %344 = vmatpush.msra.mxu3 %v145_v9  ;;  %219 = vmatpush.msra.mxu1 %v145_v9  ;;  %v135_v32 = vld [vmem:[#allocation5 + $0x88] sm:$0xff]  ;;  %v118_v33 = vld [vmem:[#allocation5] sm:$0xff]  ;;  %v74_v39 = vld [vmem:[#allocation2 + $0x70] sm:$0xff] }
  0x17   :  { %329 = vmatpush.msra.mxu2 %v128_v10  ;;  %167 = vmatpush.msra.mxu0 %v128_v10  ;;  %v134_v34 = vld [vmem:[#allocation5 + $0x80] sm:$0xff]  ;;  %v73_v36 = vld [vmem:[#allocation2 + $0x68] sm:$0xff]  ;;  %v75_v40 = vld [vmem:[#allocation2 + $0x78] sm:$0xff] }
  0x18   :  { %345 = vmatpush.msra.mxu3 %v144_v11  ;;  %220 = vmatpush.msra.mxu1 %v144_v11  ;;  %v72_v35 = vld [vmem:[#allocation2 + $0x60] sm:$0xff]  ;;  %v61_v38 = vld [vmem:[#allocation2 + $0x8] sm:$0xff]  ;;  %v62_v41 = vld [vmem:[#allocation2 + $0x10] sm:$0xff] }
  0x19   :  { %330 = vmatpush.msra.mxu2 %v127_v12  ;;  %168 = vmatpush.msra.mxu0 %v127_v12  ;;  %v60_v37 = vld [vmem:[#allocation2] sm:$0xff]  ;;  %v63_v42 = vld [vmem:[#allocation2 + $0x18] sm:$0xff]  ;;  %v77_v44 = vld [vmem:[#allocation2 + $0x88] sm:$0xff] }
  0x1a   :  { %346 = vmatpush.msra.mxu3 %v143_v13  ;;  %221 = vmatpush.msra.mxu1 %v143_v13  ;;  %v76_v43 = vld [vmem:[#allocation2 + $0x80] sm:$0xff]  ;;  %v65_v46 = vld [vmem:[#allocation2 + $0x28] sm:$0xff]  ;;  %v78_v47 = vld [vmem:[#allocation2 + $0x90] sm:$0xff] }
  0x1b   :  { %331 = vmatpush.msra.mxu2 %v126_v14  ;;  %169 = vmatpush.msra.mxu0 %v126_v14  ;;  %v64_v45 = vld [vmem:[#allocation2 + $0x20] sm:$0xff]  ;;  %v79_v48 = vld [vmem:[#allocation2 + $0x98] sm:$0xff]  ;;  %v66_v49 = vld [vmem:[#allocation2 + $0x30] sm:$0xff] }
  0x1c   :  { %347 = vmatpush.msra.mxu3 %v142_v15  ;;  %222 = vmatpush.msra.mxu1 %v142_v15  ;;  %v67_v50 = vld [vmem:[#allocation2 + $0x38] sm:$0xff]  ;;  %v80_v51 = vld [vmem:[#allocation2 + $0xa0] sm:$0xff]  ;;  %v81_v52 = vld [vmem:[#allocation2 + $0xa8] sm:$0xff] }
  0x1d   :  { %332 = vmatpush.msra.mxu2 %v125_v16  ;;  %170 = vmatpush.msra.mxu0 %v125_v16  ;;  %v68_v53 = vld [vmem:[#allocation2 + $0x40] sm:$0xff]  ;;  %v69_v54 = vld [vmem:[#allocation2 + $0x48] sm:$0xff]  ;;  %v82_v55 = vld [vmem:[#allocation2 + $0xb0] sm:$0xff] }
  0x1e   :  { %348 = vmatpush.msra.mxu3 %v141_v17  ;;  %223 = vmatpush.msra.mxu1 %v141_v17  ;;  %v83_v56 = vld [vmem:[#allocation2 + $0xb8] sm:$0xff]  ;;  %v70_v57 = vld [vmem:[#allocation2 + $0x50] sm:$0xff] }
  0x1f   :  { %333 = vmatpush.msra.mxu2 %v124_v18  ;;  %171 = vmatpush.msra.mxu0 %v124_v18  ;;  %v71_v58 = vld [vmem:[#allocation2 + $0x58] sm:$0xff] }
  0x20   :  { %349 = vmatpush.msra.mxu3 %v140_v19  ;;  %224 = vmatpush.msra.mxu1 %v140_v19 }
  0x21   :  { %334 = vmatpush.msra.mxu2 %v123_v21  ;;  %172 = vmatpush.msra.mxu0 %v123_v21 }
  0x22   :  { %350 = vmatpush.msra.mxu3 %v139_v22  ;;  %225 = vmatpush.msra.mxu1 %v139_v22 }
  0x23   :  { %335 = vmatpush.msra.mxu2 %v122_v23  ;;  %173 = vmatpush.msra.mxu0 %v122_v23 }
  0x24   :  { %351 = vmatpush.msra.mxu3 %v138_v24  ;;  %226 = vmatpush.msra.mxu1 %v138_v24 }
  0x25   :  { %336 = vmatpush.msra.mxu2 %v121_v26  ;;  %174 = vmatpush.msra.mxu0 %v121_v26 }
  0x26   :  { %352 = vmatpush.msra.mxu3 %v137_v27  ;;  %227 = vmatpush.msra.mxu1 %v137_v27 }
  0x27   :  { %337 = vmatpush.msra.mxu2 %v120_v28  ;;  %175 = vmatpush.msra.mxu0 %v120_v28 }
  0x28   :  { %353 = vmatpush.msra.mxu3 %v136_v29  ;;  %228 = vmatpush.msra.mxu1 %v136_v29 }
  0x29   :  { %338 = vmatpush.msra.mxu2 %v119_v31  ;;  %176 = vmatpush.msra.mxu0 %v119_v31 }
  0x2a   :  { %354 = vmatpush.msra.mxu3 %v135_v32  ;;  %229 = vmatpush.msra.mxu1 %v135_v32 }
  0x2b   :  { %339 = vmatpush.msra.mxu2 %v118_v33  ;;  %177 = vmatpush.msra.mxu0 %v118_v33 }
  0x2c   :  { %355 = vmatpush.msra.mxu3 %v134_v34  ;;  %196 = vmatmul.f32.vlgmr.msra.gmra.mxu2 %v72_v35 }
  0x2d   :  { %318 = vmatmul.msk.f32.vlgmr.msra.gmra.mxu3 %vm92_vm0, %v73_v36  ;;  %230 = vmatpush.msra.mxu1 %v134_v34 }
  0x2e   :  { %178 = vmatmul.f32.vlgmr.msra.gmra.mxu0 %v60_v37  ;;  %312 = vmatmul.msk.f32.vlgmr.msra.gmra.mxu1 %vm92_vm0, %v61_v38 }
  0x34   :  { %199 = vmatmul.f32.gmra.mxu2 %v74_v39 }
  0x35   :  { %319 = vmatmul.msk.f32.gmra.mxu3 %vm92_vm0, %v75_v40 }
  0x36   :  { %181 = vmatmul.f32.gmra.mxu0 %v62_v41  ;;  %313 = vmatmul.msk.f32.gmra.mxu1 %vm92_vm0, %v63_v42 }
  0x3c   :  { %202 = vmatmul.f32.gmra.mxu2 %v76_v43 }
  0x3d   :  { %320 = vmatmul.msk.f32.gmra.mxu3 %vm92_vm0, %v77_v44 }
  0x3e   :  { %184 = vmatmul.f32.gmra.mxu0 %v64_v45  ;;  %314 = vmatmul.msk.f32.gmra.mxu1 %vm92_vm0, %v65_v46 }
  0x44   :  { %205 = vmatmul.f32.gmra.mxu2 %v78_v47 }
  0x45   :  { %321 = vmatmul.msk.f32.gmra.mxu3 %vm92_vm0, %v79_v48 }
  0x46   :  { %187 = vmatmul.f32.gmra.mxu0 %v66_v49  ;;  %315 = vmatmul.msk.f32.gmra.mxu1 %vm92_vm0, %v67_v50 }
  0x4c   :  { %208 = vmatmul.f32.gmra.mxu2 %v80_v51 }
  0x4d   :  { %322 = vmatmul.msk.f32.gmra.mxu3 %vm92_vm0, %v81_v52 }
  0x4e   :  { %190 = vmatmul.f32.gmra.mxu0 %v68_v53  ;;  %316 = vmatmul.msk.f32.gmra.mxu1 %vm92_vm0, %v69_v54 }
  0x54   :  { %211 = vmatmul.f32.gmra.mxu2 %v82_v55 }
  0x55   :  { %323 = vmatmul.msk.f32.gmra.mxu3 %vm92_vm0, %v83_v56 }
  0x56   :  { %193 = vmatmul.f32.gmra.mxu0 %v70_v57  ;;  %317 = vmatmul.msk.f32.gmra.mxu1 %vm92_vm0, %v71_v58 }
  0xab   :  { %v179_v59 = vpop.f32.mrf.mxu0  ;;  %v232_v60 = vpop.f32.mrf.mxu1 }
  0xac   :  { %v233_v61 = vadd.f32 %v232_v60, %v179_v59 }
  0xae   :  { %280 = vst [vmem:[#allocation7] sm:$0xff] %v233_v61 }
  0xaf   :  { %v197_v62 = vpop.f32.mrf.mxu2 }
  0xb0   :  { %v250_v63 = vpop.f32.mrf.mxu3 }
  0xb1   :  { %v251_v0 = vadd.f32 %v250_v63, %v197_v62 }
  0xb3   :  { %v182_v1 = vpop.f32.mrf.mxu0  ;;  %v235_v2 = vpop.f32.mrf.mxu1  ;;  %286 = vst [vmem:[#allocation7 + $0x30] sm:$0xff] %v251_v0 }
  0xb4   :  { %v236_v3 = vadd.f32 %v235_v2, %v182_v1 }
  0xb6   :  { %281 = vst [vmem:[#allocation7 + $0x8] sm:$0xff] %v236_v3 }
  0xb7   :  { %v200_v4 = vpop.f32.mrf.mxu2 }
  0xb8   :  { %v253_v5 = vpop.f32.mrf.mxu3 }
  0xb9   :  { %v254_v6 = vadd.f32 %v253_v5, %v200_v4 }
  0xbb   :  { %v185_v7 = vpop.f32.mrf.mxu0  ;;  %v238_v8 = vpop.f32.mrf.mxu1  ;;  %287 = vst [vmem:[#allocation7 + $0x38] sm:$0xff] %v254_v6 }
  0xbc   :  { %v239_v9 = vadd.f32 %v238_v8, %v185_v7 }
  0xbe   :  { %282 = vst [vmem:[#allocation7 + $0x10] sm:$0xff] %v239_v9 }
  0xbf   :  { %v203_v10 = vpop.f32.mrf.mxu2 }
  0xc0   :  { %v256_v11 = vpop.f32.mrf.mxu3 }
  0xc1   :  { %v257_v12 = vadd.f32 %v256_v11, %v203_v10 }
  0xc3   :  { %v188_v13 = vpop.f32.mrf.mxu0  ;;  %v241_v14 = vpop.f32.mrf.mxu1  ;;  %288 = vst [vmem:[#allocation7 + $0x40] sm:$0xff] %v257_v12 }
  0xc4   :  { %v242_v15 = vadd.f32 %v241_v14, %v188_v13 }
  0xc6   :  { %283 = vst [vmem:[#allocation7 + $0x18] sm:$0xff] %v242_v15 }
  0xc7   :  { %v206_v16 = vpop.f32.mrf.mxu2 }
  0xc8   :  { %v259_v17 = vpop.f32.mrf.mxu3 }
  0xc9   :  { %v260_v18 = vadd.f32 %v259_v17, %v206_v16 }
  0xcb   :  { %v191_v19 = vpop.f32.mrf.mxu0  ;;  %v244_v20 = vpop.f32.mrf.mxu1  ;;  %289 = vst [vmem:[#allocation7 + $0x48] sm:$0xff] %v260_v18 }
  0xcc   :  { %v245_v21 = vadd.f32 %v244_v20, %v191_v19 }
  0xce   :  { %284 = vst [vmem:[#allocation7 + $0x20] sm:$0xff] %v245_v21 }
  0xcf   :  { %v209_v22 = vpop.f32.mrf.mxu2 }
  0xd0   :  { %v262_v23 = vpop.f32.mrf.mxu3 }
  0xd1   :  { %v263_v24 = vadd.f32 %v262_v23, %v209_v22 }
  0xd3   :  { %v194_v25 = vpop.f32.mrf.mxu0  ;;  %v247_v26 = vpop.f32.mrf.mxu1  ;;  %290 = vst [vmem:[#allocation7 + $0x50] sm:$0xff] %v263_v24 }
  0xd4   :  { %v248_v27 = vadd.f32 %v247_v26, %v194_v25 }
  0xd6   :  { %285 = vst [vmem:[#allocation7 + $0x28] sm:$0xff] %v248_v27 }
  0xd7   :  { %v212_v28 = vpop.f32.mrf.mxu2 }
  0xd8   :  { %v265_v29 = vpop.f32.mrf.mxu3 }
  0xd9   :  { %v266_v30 = vadd.f32 %v265_v29, %v212_v28 }
  0xdb   :  { %291 = vst [vmem:[#allocation7 + $0x58] sm:$0xff] %v266_v30 }
  0xdc   :  { %304 = dma.vmem_to_hbm [thread:$0]  %s297_s1, 1536, %s299_s25, [#allocation4], %s446_s21, %s446_s21, %s447_s22  }
  0xdd   :  { %440 = dma.done.wait [#allocation4], 1536  }
  0xde   :  { %441 = vsyncadd [#allocation4], 4294965760 }
  0xdf   :  { %309 = vsyncpa [#allocation3], 1 }
  0xe0   :  { %310 = vsyncpa [#allocation6], 1 }
  0xe1   :  { %311 = vsyncpa [#allocation4], 1 }

// kernel: tpu_custom_call.1
= control target key start
LH: loop header
LB: loop body
LE: loop exit
PB: predicated region body
PF: predicated region fallthrough
CT: control target
= control target key end

     0   :  { %7 = vsyncpa [#allocation3], 0  ;;  %s506_s0 = inlined_call_operand.hbm [shape: f32[96,200], index: 0, kind: input, shape index: {}]   ;;  %s507_s1 = inlined_call_operand.hbm [shape: f32[256,128], index: 1, kind: input, shape index: {}]   ;;  %s508_s2 = inlined_call_operand.hbm [shape: f32[96,128], index: 2, kind: output, shape index: {}]  }
   0x1   :  { %8 = vsyncpa [#allocation6], 0 }
   0x2   :  { %9 = vsyncpa [#allocation4], 0  ;;  %s14_s11 = sshll.u32 %s506_s0, 4  ;;  %s442_s12 = smov [#allocation2]   ;;  %s15_s11 = int_to_ptr.hbm [resolvable:$true] %s14_s11 }
   0x3   :  { %s16_s13 = sshll.u32 %s442_s12, 4  ;;  %s27_s16 = sshll.u32 %s507_s1, 4  ;;  %s17_s13 = int_to_ptr.vmem [resolvable:$true] %s16_s13  ;;  %s28_s16 = int_to_ptr.hbm [resolvable:$true] %s27_s16 }
   0x4   :  { %s443_s17 = smov 256   ;;  %s444_s18 = smov 16  }
   0x5   :  { %22 = dma.hbm_to_vmem [thread:$0]  %s15_s11, 3072, %s17_s13, [#allocation3], %s443_s17, %s443_s17, %s444_s18  }
   0x6   :  { %s445_s19 = smov [#allocation5]   ;;  %s446_s21 = smov 128  }
   0x7   :  { %s29_s20 = sshll.u32 %s445_s19, 4  ;;  %s447_s22 = smov 8   ;;  %s30_s20 = int_to_ptr.vmem [resolvable:$true] %s29_s20 }
   0x8   :  { %35 = dma.hbm_to_vmem [thread:$0]  %s28_s16, 4096, %s30_s20, [#allocation6], %s446_s21, %s446_s21, %s447_s22  }
   0x9   :  { %436 = dma.done.wait [#allocation3], 3072  }
   0xa   :  { %437 = vsyncadd [#allocation3], 4294964224 }
   0xb   :  { %438 = dma.done.wait [#allocation6], 4096  }
   0xc   :  { %439 = vsyncadd [#allocation6], 4294963200  ;;  %v133_v0 = vld [vmem:[#allocation5 + $0x78] sm:$0xff]  ;;  %v132_v2 = vld [vmem:[#allocation5 + $0x70] sm:$0xff]  ;;  %v84_v20 = vlaneseq  ;;  %s448_s0 = smov [#allocation7]   ;;  %s298_s25 = sshll.u32 %s508_s2, 4  ;;  %s299_s25 = int_to_ptr.hbm [resolvable:$true] %s298_s25 }
   0xd   :  { %v149_v1 = vld [vmem:[#allocation5 + $0xf8] sm:$0xff]  ;;  %324 = vmatpush.msra.mxu2 %v133_v0  ;;  %v148_v3 = vld [vmem:[#allocation5 + $0xf0] sm:$0xff]  ;;  %v131_v4 = vld [vmem:[#allocation5 + $0x68] sm:$0xff]  ;;  %162 = vmatpush.msra.mxu0 %v133_v0  ;;  %s296_s1 = sshll.u32 %s448_s0, 4  ;;  %s297_s1 = int_to_ptr.vmem [resolvable:$true] %s296_s1 }
   0xe   :  { %340 = vmatpush.msra.mxu3 %v149_v1  ;;  %v147_v5 = vld [vmem:[#allocation5 + $0xe8] sm:$0xff]  ;;  %215 = vmatpush.msra.mxu1 %v149_v1  ;;  %v130_v6 = vld [vmem:[#allocation5 + $0x60] sm:$0xff]  ;;  %v129_v8 = vld [vmem:[#allocation5 + $0x58] sm:$0xff]  ;;  %v85_v25 = vand.u32 127, %v84_v20 }
   0xf   :  { %325 = vmatpush.msra.mxu2 %v132_v2  ;;  %v146_v7 = vld [vmem:[#allocation5 + $0xe0] sm:$0xff]  ;;  %163 = vmatpush.msra.mxu0 %v132_v2  ;;  %v145_v9 = vld [vmem:[#allocation5 + $0xd8] sm:$0xff]  ;;  %v128_v10 = vld [vmem:[#allocation5 + $0x50] sm:$0xff] }
  0x10   :  { %341 = vmatpush.msra.mxu3 %v148_v3  ;;  %216 = vmatpush.msra.mxu1 %v148_v3  ;;  %v144_v11 = vld [vmem:[#allocation5 + $0xd0] sm:$0xff]  ;;  %v127_v12 = vld [vmem:[#allocation5 + $0x48] sm:$0xff]  ;;  %v126_v14 = vld [vmem:[#allocation5 + $0x40] sm:$0xff]  ;;  %v473_v30 = vadd.s32 128, %v85_v25 }
  0x11   :  { %326 = vmatpush.msra.mxu2 %v131_v4  ;;  %164 = vmatpush.msra.mxu0 %v131_v4  ;;  %v143_v13 = vld [vmem:[#allocation5 + $0xc8] sm:$0xff]  ;;  %v142_v15 = vld [vmem:[#allocation5 + $0xc0] sm:$0xff]  ;;  %v125_v16 = vld [vmem:[#allocation5 + $0x38] sm:$0xff] }
  0x12   :  { %342 = vmatpush.msra.mxu3 %v147_v5  ;;  %217 = vmatpush.msra.mxu1 %v147_v5  ;;  %v141_v17 = vld [vmem:[#allocation5 + $0xb8] sm:$0xff]  ;;  %v124_v18 = vld [vmem:[#allocation5 + $0x30] sm:$0xff]  ;;  %v123_v21 = vld [vmem:[#allocation5 + $0x28] sm:$0xff]  ;;  %vm92_vm0 = vcmp.lt.s32.totalorder %v473_v30, 200 }
  0x13   :  { %327 = vmatpush.msra.mxu2 %v130_v6  ;;  %165 = vmatpush.msra.mxu0 %v130_v6  ;;  %v140_v19 = vld [vmem:[#allocation5 + $0xb0] sm:$0xff]  ;;  %v139_v22 = vld [vmem:[#allocation5 + $0xa8] sm:$0xff]  ;;  %v122_v23 = vld [vmem:[#allocation5 + $0x20] sm:$0xff] }
  0x14   :  { %343 = vmatpush.msra.mxu3 %v146_v7  ;;  %218 = vmatpush.msra.mxu1 %v146_v7  ;;  %v138_v24 = vld [vmem:[#allocation5 + $0xa0] sm:$0xff]  ;;  %v121_v26 = vld [vmem:[#allocation5 + $0x18] sm:$0xff]  ;;  %v120_v28 = vld [vmem:[#allocation5 + $0x10] sm:$0xff] }
  0x15   :  { %328 = vmatpush.msra.mxu2 %v129_v8  ;;  %166 = vmatpush.msra.mxu0 %v129_v8  ;;  %v137_v27 = vld [vmem:[#allocation5 + $0x98] sm:$0xff]  ;;  %v136_v29 = vld [vmem:[#allocation5 + $0x90] sm:$0xff]  ;;  %v119_v31 = vld [vmem:[#allocation5 + $0x8] sm:$0xff] }
  0x16   :  { %344 = vmatpush.msra.mxu3 %v145_v9  ;;  %219 = vmatpush.msra.mxu1 %v145_v9  ;;  %v135_v32 = vld [vmem:[#allocation5 + $0x88] sm:$0xff]  ;;  %v118_v33 = vld [vmem:[#allocation5] sm:$0xff]  ;;  %v74_v39 = vld [vmem:[#allocation2 + $0x70] sm:$0xff] }
  0x17   :  { %329 = vmatpush.msra.mxu2 %v128_v10  ;;  %167 = vmatpush.msra.mxu0 %v128_v10  ;;  %v134_v34 = vld [vmem:[#allocation5 + $0x80] sm:$0xff]  ;;  %v73_v36 = vld [vmem:[#allocation2 + $0x68] sm:$0xff]  ;;  %v75_v40 = vld [vmem:[#allocation2 + $0x78] sm:$0xff] }
  0x18   :  { %345 = vmatpush.msra.mxu3 %v144_v11  ;;  %220 = vmatpush.msra.mxu1 %v144_v11  ;;  %v72_v35 = vld [vmem:[#allocation2 + $0x60] sm:$0xff]  ;;  %v61_v38 = vld [vmem:[#allocation2 + $0x8] sm:$0xff]  ;;  %v62_v41 = vld [vmem:[#allocation2 + $0x10] sm:$0xff] }
  0x19   :  { %330 = vmatpush.msra.mxu2 %v127_v12  ;;  %168 = vmatpush.msra.mxu0 %v127_v12  ;;  %v60_v37 = vld [vmem:[#allocation2] sm:$0xff]  ;;  %v63_v42 = vld [vmem:[#allocation2 + $0x18] sm:$0xff]  ;;  %v77_v44 = vld [vmem:[#allocation2 + $0x88] sm:$0xff] }
  0x1a   :  { %346 = vmatpush.msra.mxu3 %v143_v13  ;;  %221 = vmatpush.msra.mxu1 %v143_v13  ;;  %v76_v43 = vld [vmem:[#allocation2 + $0x80] sm:$0xff]  ;;  %v65_v46 = vld [vmem:[#allocation2 + $0x28] sm:$0xff]  ;;  %v78_v47 = vld [vmem:[#allocation2 + $0x90] sm:$0xff] }
  0x1b   :  { %331 = vmatpush.msra.mxu2 %v126_v14  ;;  %169 = vmatpush.msra.mxu0 %v126_v14  ;;  %v64_v45 = vld [vmem:[#allocation2 + $0x20] sm:$0xff]  ;;  %v79_v48 = vld [vmem:[#allocation2 + $0x98] sm:$0xff]  ;;  %v66_v49 = vld [vmem:[#allocation2 + $0x30] sm:$0xff] }
  0x1c   :  { %347 = vmatpush.msra.mxu3 %v142_v15  ;;  %222 = vmatpush.msra.mxu1 %v142_v15  ;;  %v67_v50 = vld [vmem:[#allocation2 + $0x38] sm:$0xff]  ;;  %v80_v51 = vld [vmem:[#allocation2 + $0xa0] sm:$0xff]  ;;  %v81_v52 = vld [vmem:[#allocation2 + $0xa8] sm:$0xff] }
  0x1d   :  { %332 = vmatpush.msra.mxu2 %v125_v16  ;;  %170 = vmatpush.msra.mxu0 %v125_v16  ;;  %v68_v53 = vld [vmem:[#allocation2 + $0x40] sm:$0xff]  ;;  %v69_v54 = vld [vmem:[#allocation2 + $0x48] sm:$0xff]  ;;  %v82_v55 = vld [vmem:[#allocation2 + $0xb0] sm:$0xff] }
  0x1e   :  { %348 = vmatpush.msra.mxu3 %v141_v17  ;;  %223 = vmatpush.msra.mxu1 %v141_v17  ;;  %v83_v56 = vld [vmem:[#allocation2 + $0xb8] sm:$0xff]  ;;  %v70_v57 = vld [vmem:[#allocation2 + $0x50] sm:$0xff] }
  0x1f   :  { %333 = vmatpush.msra.mxu2 %v124_v18  ;;  %171 = vmatpush.msra.mxu0 %v124_v18  ;;  %v71_v58 = vld [vmem:[#allocation2 + $0x58] sm:$0xff] }
  0x20   :  { %349 = vmatpush.msra.mxu3 %v140_v19  ;;  %224 = vmatpush.msra.mxu1 %v140_v19 }
  0x21   :  { %334 = vmatpush.msra.mxu2 %v123_v21  ;;  %172 = vmatpush.msra.mxu0 %v123_v21 }
  0x22   :  { %350 = vmatpush.msra.mxu3 %v139_v22  ;;  %225 = vmatpush.msra.mxu1 %v139_v22 }
  0x23   :  { %335 = vmatpush.msra.mxu2 %v122_v23  ;;  %173 = vmatpush.msra.mxu0 %v122_v23 }
  0x24   :  { %351 = vmatpush.msra.mxu3 %v138_v24  ;;  %226 = vmatpush.msra.mxu1 %v138_v24 }
  0x25   :  { %336 = vmatpush.msra.mxu2 %v121_v26  ;;  %174 = vmatpush.msra.mxu0 %v121_v26 }
  0x26   :  { %352 = vmatpush.msra.mxu3 %v137_v27  ;;  %227 = vmatpush.msra.mxu1 %v137_v27 }
  0x27   :  { %337 = vmatpush.msra.mxu2 %v120_v28  ;;  %175 = vmatpush.msra.mxu0 %v120_v28 }
  0x28   :  { %353 = vmatpush.msra.mxu3 %v136_v29  ;;  %228 = vmatpush.msra.mxu1 %v136_v29 }
  0x29   :  { %338 = vmatpush.msra.mxu2 %v119_v31  ;;  %176 = vmatpush.msra.mxu0 %v119_v31 }
  0x2a   :  { %354 = vmatpush.msra.mxu3 %v135_v32  ;;  %229 = vmatpush.msra.mxu1 %v135_v32 }
  0x2b   :  { %339 = vmatpush.msra.mxu2 %v118_v33  ;;  %177 = vmatpush.msra.mxu0 %v118_v33 }
  0x2c   :  { %355 = vmatpush.msra.mxu3 %v134_v34  ;;  %196 = vmatmul.f32.vlgmr.msra.gmra.mxu2 %v72_v35 }
  0x2d   :  { %318 = vmatmul.msk.f32.vlgmr.msra.gmra.mxu3 %vm92_vm0, %v73_v36  ;;  %230 = vmatpush.msra.mxu1 %v134_v34 }
  0x2e   :  { %178 = vmatmul.f32.vlgmr.msra.gmra.mxu0 %v60_v37  ;;  %312 = vmatmul.msk.f32.vlgmr.msra.gmra.mxu1 %vm92_vm0, %v61_v38 }
  0x34   :  { %199 = vmatmul.f32.gmra.mxu2 %v74_v39 }
  0x35   :  { %319 = vmatmul.msk.f32.gmra.mxu3 %vm92_vm0, %v75_v40 }
  0x36   :  { %181 = vmatmul.f32.gmra.mxu0 %v62_v41  ;;  %313 = vmatmul.msk.f32.gmra.mxu1 %vm92_vm0, %v63_v42 }
  0x3c   :  { %202 = vmatmul.f32.gmra.mxu2 %v76_v43 }
  0x3d   :  { %320 = vmatmul.msk.f32.gmra.mxu3 %vm92_vm0, %v77_v44 }
  0x3e   :  { %184 = vmatmul.f32.gmra.mxu0 %v64_v45  ;;  %314 = vmatmul.msk.f32.gmra.mxu1 %vm92_vm0, %v65_v46 }
  0x44   :  { %205 = vmatmul.f32.gmra.mxu2 %v78_v47 }
  0x45   :  { %321 = vmatmul.msk.f32.gmra.mxu3 %vm92_vm0, %v79_v48 }
  0x46   :  { %187 = vmatmul.f32.gmra.mxu0 %v66_v49  ;;  %315 = vmatmul.msk.f32.gmra.mxu1 %vm92_vm0, %v67_v50 }
  0x4c   :  { %208 = vmatmul.f32.gmra.mxu2 %v80_v51 }
  0x4d   :  { %322 = vmatmul.msk.f32.gmra.mxu3 %vm92_vm0, %v81_v52 }
  0x4e   :  { %190 = vmatmul.f32.gmra.mxu0 %v68_v53  ;;  %316 = vmatmul.msk.f32.gmra.mxu1 %vm92_vm0, %v69_v54 }
  0x54   :  { %211 = vmatmul.f32.gmra.mxu2 %v82_v55 }
  0x55   :  { %323 = vmatmul.msk.f32.gmra.mxu3 %vm92_vm0, %v83_v56 }
  0x56   :  { %193 = vmatmul.f32.gmra.mxu0 %v70_v57  ;;  %317 = vmatmul.msk.f32.gmra.mxu1 %vm92_vm0, %v71_v58 }
  0xab   :  { %v179_v59 = vpop.f32.mrf.mxu0  ;;  %v232_v60 = vpop.f32.mrf.mxu1 }
  0xac   :  { %v233_v61 = vadd.f32 %v232_v60, %v179_v59 }
  0xae   :  { %280 = vst [vmem:[#allocation7] sm:$0xff] %v233_v61 }
  0xaf   :  { %v197_v62 = vpop.f32.mrf.mxu2 }
  0xb0   :  { %v250_v63 = vpop.f32.mrf.mxu3 }
  0xb1   :  { %v251_v0 = vadd.f32 %v250_v63, %v197_v62 }
  0xb3   :  { %v182_v1 = vpop.f32.mrf.mxu0  ;;  %v235_v2 = vpop.f32.mrf.mxu1  ;;  %286 = vst [vmem:[#allocation7 + $0x30] sm:$0xff] %v251_v0 }
  0xb4   :  { %v236_v3 = vadd.f32 %v235_v2, %v182_v1 }
  0xb6   :  { %281 = vst [vmem:[#allocation7 + $0x8] sm:$0xff] %v236_v3 }
  0xb7   :  { %v200_v4 = vpop.f32.mrf.mxu2 }
  0xb8   :  { %v253_v5 = vpop.f32.mrf.mxu3 }
  0xb9   :  { %v254_v6 = vadd.f32 %v253_v5, %v200_v4 }
  0xbb   :  { %v185_v7 = vpop.f32.mrf.mxu0  ;;  %v238_v8 = vpop.f32.mrf.mxu1  ;;  %287 = vst [vmem:[#allocation7 + $0x38] sm:$0xff] %v254_v6 }
  0xbc   :  { %v239_v9 = vadd.f32 %v238_v8, %v185_v7 }
  0xbe   :  { %282 = vst [vmem:[#allocation7 + $0x10] sm:$0xff] %v239_v9 }
  0xbf   :  { %v203_v10 = vpop.f32.mrf.mxu2 }
  0xc0   :  { %v256_v11 = vpop.f32.mrf.mxu3 }
  0xc1   :  { %v257_v12 = vadd.f32 %v256_v11, %v203_v10 }
  0xc3   :  { %v188_v13 = vpop.f32.mrf.mxu0  ;;  %v241_v14 = vpop.f32.mrf.mxu1  ;;  %288 = vst [vmem:[#allocation7 + $0x40] sm:$0xff] %v257_v12 }
  0xc4   :  { %v242_v15 = vadd.f32 %v241_v14, %v188_v13 }
  0xc6   :  { %283 = vst [vmem:[#allocation7 + $0x18] sm:$0xff] %v242_v15 }
  0xc7   :  { %v206_v16 = vpop.f32.mrf.mxu2 }
  0xc8   :  { %v259_v17 = vpop.f32.mrf.mxu3 }
  0xc9   :  { %v260_v18 = vadd.f32 %v259_v17, %v206_v16 }
  0xcb   :  { %v191_v19 = vpop.f32.mrf.mxu0  ;;  %v244_v20 = vpop.f32.mrf.mxu1  ;;  %289 = vst [vmem:[#allocation7 + $0x48] sm:$0xff] %v260_v18 }
  0xcc   :  { %v245_v21 = vadd.f32 %v244_v20, %v191_v19 }
  0xce   :  { %284 = vst [vmem:[#allocation7 + $0x20] sm:$0xff] %v245_v21 }
  0xcf   :  { %v209_v22 = vpop.f32.mrf.mxu2 }
  0xd0   :  { %v262_v23 = vpop.f32.mrf.mxu3 }
  0xd1   :  { %v263_v24 = vadd.f32 %v262_v23, %v209_v22 }
  0xd3   :  { %v194_v25 = vpop.f32.mrf.mxu0  ;;  %v247_v26 = vpop.f32.mrf.mxu1  ;;  %290 = vst [vmem:[#allocation7 + $0x50] sm:$0xff] %v263_v24 }
  0xd4   :  { %v248_v27 = vadd.f32 %v247_v26, %v194_v25 }
  0xd6   :  { %285 = vst [vmem:[#allocation7 + $0x28] sm:$0xff] %v248_v27 }
  0xd7   :  { %v212_v28 = vpop.f32.mrf.mxu2 }
  0xd8   :  { %v265_v29 = vpop.f32.mrf.mxu3 }
  0xd9   :  { %v266_v30 = vadd.f32 %v265_v29, %v212_v28 }
  0xdb   :  { %291 = vst [vmem:[#allocation7 + $0x58] sm:$0xff] %v266_v30 }
  0xdc   :  { %304 = dma.vmem_to_hbm [thread:$0]  %s297_s1, 1536, %s299_s25, [#allocation4], %s446_s21, %s446_s21, %s447_s22  }
  0xdd   :  { %440 = dma.done.wait [#allocation4], 1536  }
  0xde   :  { %441 = vsyncadd [#allocation4], 4294965760 }
  0xdf   :  { %309 = vsyncpa [#allocation3], 1 }
  0xe0   :  { %310 = vsyncpa [#allocation6], 1 }
  0xe1   :  { %311 = vsyncpa [#allocation4], 1 }

</bundles_post_ra>
